<compile_context>
chip_gen: v5e
topology: v5e:2x2
jax: 0.10.0
libtpu: 0.0.40
codegen_flags: <defaults>
</compile_context>

<pallas_src>
import functools

import jax
import jax.numpy as jnp
from jax.experimental import pallas as pl
from jax.experimental.pallas import tpu as pltpu

EPS = 1e-6


def _sublayer_connection_kernel(x_ref, w_ref, b_ref, g_ref, be_ref, o_ref, *,
                                precision):
    """One grid step = one tile of rows; everything it needs is resident.

    x_ref : (TM, H)  input rows (matmul LHS *and* residual -- single copy)
    w_ref : (H, H)   Linear weight, constant block index -> DMA'd once, resident
    b_ref, g_ref, be_ref : (1, H)  Linear bias / LayerNorm a_2 / LayerNorm b_2
    o_ref : (TM, H)  output rows (lane-dense stores)
    """
    x = x_ref[...]

    # --- sublayer(x): Linear(H, H) on the MXU, f32 accumulation ---
    y = jnp.dot(x, w_ref[...], preferred_element_type=jnp.float32,
                precision=precision)
    y = y + b_ref[...].astype(jnp.float32)                      # (TM, H) f32

    # --- dropout: nn.Dropout in eval mode is the identity ---
    # TODO(synk): training-mode dropout (mask + 1/(1-p) scaling) needs pltpu.prng_*.

    # --- LayerNorm (module semantics: unbiased std, eps added to std) ---
    h = y.shape[-1]
    mean = jnp.sum(y, axis=-1, keepdims=True) * (1.0 / h)
    d = y - mean
    var = jnp.sum(d * d, axis=-1, keepdims=True) * (1.0 / max(h - 1, 1))
    inv = 1.0 / (jnp.sqrt(var) + EPS)                           # (TM, 1), exact
    normed = (d * inv) * g_ref[...].astype(jnp.float32) + be_ref[...].astype(jnp.float32)

    # --- residual: x + norm(sublayer_out) ---
    o_ref[...] = (x.astype(jnp.float32) + normed).astype(o_ref.dtype)


def _round_up(x, m):
    return (x + m - 1) // m * m


def _vmem_capacity_bytes():
    """Physical VMEM per TensorCore, with a conservative fallback."""
    try:
        return int(pltpu.get_tpu_info().vmem_capacity_bytes)
    except Exception:
        return 64 * 1024 * 1024          # v7x per-TC size: safe lower bound


def _pick_row_tile(n_rows, h, itemsize, want, budget):
    """Row tile: multiple of 8, <= want, fits the VMEM budget, and (when possible)
    leaves the 'parallel' row axis with >= 2 tiles for v7x's two TensorCores."""
    tm = min(_round_up(want, 8), _round_up(n_rows, 8))
    if n_rows > 8 and pl.cdiv(n_rows, tm) < 2:
        tm = max(8, _round_up(pl.cdiv(n_rows, 2), 8))

    def est(t):  # double-buffered x / out blocks + f32 epilogue intermediates
        return t * h * (4 * itemsize + 8)

    while tm > 8 and est(tm) > budget:
        tm = max(8, _round_up(tm // 2, 8))
    return tm


def sublayer_connection(x, w, b, gamma, beta, *, row_tile=256,
                        precision=jax.lax.Precision.HIGHEST):
    """x: [B, S, H]; w: [H, H]; b, gamma, beta: [H]. Returns [B, S, H].

    For peak MXU rate on real workloads pass bf16 x / w; the f32 + HIGHEST
    default is chosen so the demo matches the pure-JAX reference tightly.
    """
    B, S, H = x.shape
    N = B * S

    cap = _vmem_capacity_bytes()
    budget = cap - cap // 8              # ~112 MiB on v5e/v6e, ~56 MiB on v7x
    w_bytes = 2 * H * H * w.dtype.itemsize       # resident weight (2x buffer bound)
    param_bytes = 8 * H * 4
    if w_bytes + param_bytes > budget:
        # TODO(synk): K-streaming variant (grid over H with an f32 VMEM accumulator,
        # row_tile >= 512) for hidden sizes whose (H, H) weight cannot stay resident.
        raise NotImplementedError(
            f"Linear weight ({H}x{H}) does not fit resident in VMEM ({budget} bytes)")

    tm = _pick_row_tile(N, H, x.dtype.itemsize, row_tile,
                        budget - w_bytes - param_bytes)
    n_tiles = pl.cdiv(N, tm)
    Np = n_tiles * tm

    x2 = x.reshape(N, H)
    if Np != N:
        # Zero-pad the ragged last row tile; padded rows stay finite (LayerNorm of
        # the bias vector) and are sliced off below.
        x2 = jnp.pad(x2, ((0, Np - N), (0, 0)))
    b2 = b.reshape(1, H)
    g2 = gamma.reshape(1, H)
    be2 = beta.reshape(1, H)

    est = (4 * tm * H * x.dtype.itemsize         # x + out blocks, double-buffered
           + 2 * tm * H * 4                      # f32 epilogue intermediates
           + w_bytes + param_bytes)
    vmem_limit = int(min(budget, max(est * 5 // 4, 32 * 1024 * 1024)))

    kernel = functools.partial(_sublayer_connection_kernel, precision=precision)
    out = pl.pallas_call(
        kernel,
        out_shape=jax.ShapeDtypeStruct((Np, H), x.dtype),
        grid=(n_tiles,),
        in_specs=[
            pl.BlockSpec((tm, H), lambda i: (i, 0)),   # x: matmul LHS + residual
            pl.BlockSpec((H, H), lambda i: (0, 0)),    # W: resident (constant index)
            pl.BlockSpec((1, H), lambda i: (0, 0)),    # Linear bias
            pl.BlockSpec((1, H), lambda i: (0, 0)),    # LayerNorm a_2
            pl.BlockSpec((1, H), lambda i: (0, 0)),    # LayerNorm b_2
        ],
        out_specs=pl.BlockSpec((tm, H), lambda i: (i, 0)),
        compiler_params=pltpu.CompilerParams(
            dimension_semantics=("parallel",),
            vmem_limit_bytes=vmem_limit),
    )(x2, w, b2, g2, be2)

    if Np != N:
        out = out[:N]
    return out.reshape(B, S, H)


def _reference(x, w, b, gamma, beta, precision=jax.lax.Precision.HIGHEST):
    # Pure-JAX reference with identical semantics (unbiased std, eps on std).
    y = jnp.einsum("bsh,hk->bsk", x, w, precision=precision) + b
    mean = jnp.mean(y, axis=-1, keepdims=True)
    std = jnp.std(y, axis=-1, keepdims=True, ddof=1)
    return x + (gamma * (y - mean) / (std + EPS) + beta)


if __name__ == "__main__":
    key = jax.random.PRNGKey(0)
    k1, k2, k3, k4, k5 = jax.random.split(key, 5)

    # --- small shape implied by the module (size = hidden = 32) ---
    B, S, H = 2, 8, 32
    x = jax.random.normal(k1, (B, S, H), dtype=jnp.float32)
    w = jax.random.normal(k2, (H, H), dtype=jnp.float32) * (1.0 / jnp.sqrt(H))
    b = 0.1 * jax.random.normal(k3, (H,), dtype=jnp.float32)
    gamma = 1.0 + 0.1 * jax.random.normal(k4, (H,), dtype=jnp.float32)
    beta = 0.1 * jax.random.normal(k5, (H,), dtype=jnp.float32)

    out = jax.block_until_ready(sublayer_connection(x, w, b, gamma, beta))
    ref = _reference(x, w, b, gamma, beta)
    assert out.shape == ref.shape
    assert jnp.allclose(out, ref, atol=1e-3, rtol=1e-3), "mismatch vs reference (small)"

    # --- lane-dense shape exercising multiple row tiles + ragged-row padding ---
    B2, S2, H2 = 2, 13, 256            # N = 26 -> two 16-row tiles, padded tail
    xb = jax.random.normal(k1, (B2, S2, H2), dtype=jnp.float32)
    wb = jax.random.normal(k2, (H2, H2), dtype=jnp.float32) * (1.0 / jnp.sqrt(H2))
    bb = 0.1 * jax.random.normal(k3, (H2,), dtype=jnp.float32)
    gb = 1.0 + 0.1 * jax.random.normal(k4, (H2,), dtype=jnp.float32)
    beb = 0.1 * jax.random.normal(k5, (H2,), dtype=jnp.float32)

    out2 = jax.block_until_ready(sublayer_connection(xb, wb, bb, gb, beb))
    ref2 = _reference(xb, wb, bb, gb, beb)
    assert jnp.allclose(out2, ref2, atol=1e-3, rtol=1e-3), "mismatch vs reference (tiled)"

    print("KERNEL_OK")
</pallas_src>

<mosaic_0001>
module attributes {stable_mosaic.version = 11 : i64} {
  func.func @_sublayer_connection_kernel(%arg0: i32, %arg1: memref<8x32xf32, #tpu.memory_space<vmem>>, %arg2: memref<32x32xf32, #tpu.memory_space<vmem>>, %arg3: memref<1x32xf32, #tpu.memory_space<vmem>>, %arg4: memref<1x32xf32, #tpu.memory_space<vmem>>, %arg5: memref<1x32xf32, #tpu.memory_space<vmem>>, %arg6: memref<8x32xf32, #tpu.memory_space<vmem>>) attributes {dimension_semantics = [#tpu.dimension_semantics<parallel>], iteration_bounds = array<i64: 2>, scalar_prefetch = 0 : i64, scratch_operands = 0 : i64, tpu.core_type = #tpu.core_type<tc>, window_params = [{transform_indices = @transform_0, window_bounds = array<i64: 8, 32>}, {pipeline_mode = #tpu.pipeline_mode<synchronous>, transform_indices = @transform_1, window_bounds = array<i64: 32, 32>}, {pipeline_mode = #tpu.pipeline_mode<synchronous>, transform_indices = @transform_2, window_bounds = array<i64: 1, 32>}, {pipeline_mode = #tpu.pipeline_mode<synchronous>, transform_indices = @transform_3, window_bounds = array<i64: 1, 32>}, {pipeline_mode = #tpu.pipeline_mode<synchronous>, transform_indices = @transform_4, window_bounds = array<i64: 1, 32>}, {transform_indices = @transform_5, window_bounds = array<i64: 8, 32>}]} {
    %c0 = arith.constant 0 : index
    %c0_0 = arith.constant 0 : index
    %0 = vector.load %arg1[%c0, %c0_0] : memref<8x32xf32, #tpu.memory_space<vmem>>, vector<8x32xf32>
    %c0_1 = arith.constant 0 : index
    %c0_2 = arith.constant 0 : index
    %1 = vector.load %arg2[%c0_1, %c0_2] : memref<32x32xf32, #tpu.memory_space<vmem>>, vector<32x32xf32>
    %cst = arith.constant dense<0.000000e+00> : vector<8x32xf32>
    %2 = tpu.matmul %0, %1, %cst {dimension_numbers = #tpu.dot_dimension_numbers<[1], [0], [0], [1], [0, 0, 1, 1], [], []>, precision = #tpu.contract_precision<fp32>} : vector<8x32xf32>, vector<32x32xf32>, vector<8x32xf32> -> vector<8x32xf32>
    %c0_3 = arith.constant 0 : index
    %c0_4 = arith.constant 0 : index
    %3 = vector.load %arg3[%c0_3, %c0_4] : memref<1x32xf32, #tpu.memory_space<vmem>>, vector<1x32xf32>
    %4 = vector.broadcast %3 : vector<1x32xf32> to vector<8x32xf32>
    %5 = arith.addf %2, %4 : vector<8x32xf32>
    %cst_5 = arith.constant dense<0.000000e+00> : vector<8xf32>
    %6 = vector.multi_reduction <add>, %5, %cst_5 [1] : vector<8x32xf32> to vector<8xf32>
    %7 = vector.shape_cast %6 : vector<8xf32> to vector<8x1xf32>
    %cst_6 = arith.constant 3.125000e-02 : f32
    %8 = vector.broadcast %cst_6 : f32 to vector<8x1xf32>
    %9 = arith.mulf %7, %8 : vector<8x1xf32>
    %10 = vector.broadcast %9 : vector<8x1xf32> to vector<8x32xf32>
    %11 = arith.subf %5, %10 : vector<8x32xf32>
    %12 = arith.mulf %11, %11 : vector<8x32xf32>
    %cst_7 = arith.constant dense<0.000000e+00> : vector<8xf32>
    %13 = vector.multi_reduction <add>, %12, %cst_7 [1] : vector<8x32xf32> to vector<8xf32>
    %14 = vector.shape_cast %13 : vector<8xf32> to vector<8x1xf32>
    %cst_8 = arith.constant 0.0322580636 : f32
    %15 = vector.broadcast %cst_8 : f32 to vector<8x1xf32>
    %16 = arith.mulf %14, %15 : vector<8x1xf32>
    %17 = math.sqrt %16 : vector<8x1xf32>
    %cst_9 = arith.constant 9.99999997E-7 : f32
    %18 = vector.broadcast %cst_9 : f32 to vector<8x1xf32>
    %19 = arith.addf %17, %18 : vector<8x1xf32>
    %cst_10 = arith.constant 1.000000e+00 : f32
    %20 = vector.broadcast %cst_10 : f32 to vector<8x1xf32>
    %21 = arith.divf %20, %19 : vector<8x1xf32>
    %22 = vector.broadcast %21 : vector<8x1xf32> to vector<8x32xf32>
    %23 = arith.mulf %11, %22 : vector<8x32xf32>
    %c0_11 = arith.constant 0 : index
    %c0_12 = arith.constant 0 : index
    %24 = vector.load %arg4[%c0_11, %c0_12] : memref<1x32xf32, #tpu.memory_space<vmem>>, vector<1x32xf32>
    %25 = vector.broadcast %24 : vector<1x32xf32> to vector<8x32xf32>
    %26 = arith.mulf %23, %25 : vector<8x32xf32>
    %c0_13 = arith.constant 0 : index
    %c0_14 = arith.constant 0 : index
    %27 = vector.load %arg5[%c0_13, %c0_14] : memref<1x32xf32, #tpu.memory_space<vmem>>, vector<1x32xf32>
    %28 = vector.broadcast %27 : vector<1x32xf32> to vector<8x32xf32>
    %29 = arith.addf %26, %28 : vector<8x32xf32>
    %30 = arith.addf %0, %29 : vector<8x32xf32>
    %c0_15 = arith.constant 0 : index
    %c0_16 = arith.constant 0 : index
    %31 = vector.load %arg6[%c0_15, %c0_16] : memref<8x32xf32, #tpu.memory_space<vmem>>, vector<8x32xf32>
    tpu.vector_store %arg6[%c0_15, %c0_16], %30 {strides = array<i32>} : memref<8x32xf32, #tpu.memory_space<vmem>>, vector<8x32xf32>,
    return
  }
  func.func @transform_0(%arg0: i32) -> (i32, i32) {
    %c0_i32 = arith.constant 0 : i32
    %c0_i32_0 = arith.constant 0 : i32
    return %arg0, %c0_i32 : i32, i32
  }
  func.func @transform_1(%arg0: i32) -> (i32, i32) {
    %c0_i32 = arith.constant 0 : i32
    %c0_i32_0 = arith.constant 0 : i32
    %c0_i32_1 = arith.constant 0 : i32
    return %c0_i32, %c0_i32_0 : i32, i32
  }
  func.func @transform_2(%arg0: i32) -> (i32, i32) {
    %c0_i32 = arith.constant 0 : i32
    %c0_i32_0 = arith.constant 0 : i32
    %c0_i32_1 = arith.constant 0 : i32
    return %c0_i32, %c0_i32_0 : i32, i32
  }
  func.func @transform_3(%arg0: i32) -> (i32, i32) {
    %c0_i32 = arith.constant 0 : i32
    %c0_i32_0 = arith.constant 0 : i32
    %c0_i32_1 = arith.constant 0 : i32
    return %c0_i32, %c0_i32_0 : i32, i32
  }
  func.func @transform_4(%arg0: i32) -> (i32, i32) {
    %c0_i32 = arith.constant 0 : i32
    %c0_i32_0 = arith.constant 0 : i32
    %c0_i32_1 = arith.constant 0 : i32
    return %c0_i32, %c0_i32_0 : i32, i32
  }
  func.func @transform_5(%arg0: i32) -> (i32, i32) {
    %c0_i32 = arith.constant 0 : i32
    %c0_i32_0 = arith.constant 0 : i32
    return %arg0, %c0_i32 : i32, i32
  }
}

</mosaic_0001>

<bundles_post_ra>
// kernel: tpu_custom_call.1
= control target key start
LH: loop header
LB: loop body
LE: loop exit
PB: predicated region body
PF: predicated region fallthrough
CT: control target
= control target key end

     0   :  { %10 = vsyncpa [#allocation3], 0  ;;  %s1006_s0 = inlined_call_operand.hbm [shape: f32[16,32], index: 0, kind: input, shape index: {}]   ;;  %s1007_s1 = inlined_call_operand.hbm [shape: f32[32,32], index: 1, kind: input, shape index: {}]   ;;  %s1008_s2 = inlined_call_operand.vmem [shape: f32[1,32], index: 2, kind: input, shape index: {}]   ;;  %s1009_s3 = inlined_call_operand.vmem [shape: f32[1,32], index: 3, kind: input, shape index: {}]   ;;  %s1010_s4 = inlined_call_operand.vmem [shape: f32[1,32], index: 4, kind: input, shape index: {}]   ;;  %s1011_s5 = inlined_call_operand.hbm [shape: f32[16,32], index: 5, kind: output, shape index: {}]  }
   0x1   :  { %12 = vsyncpa [#allocation3 + $0x1], 0 }
   0x2   :  { %13 = vsyncpa [#allocation6], 0 }
   0x3   :  { %14 = vsyncpa [#allocation4], 0 }
   0x4   :  { %16 = vsyncpa [#allocation4 + $0x1], 0  ;;  %s849_s18 = smov 0   ;;  %s851_s19 = smov 0  }
   0x5   :  { %s853_s20 = smov 0   ;;  %s855_s21 = smov 0  }
   0x6 LB: > { %s174_s24 = sshll.u32 %s1007_s1, 4  ;;  %s873_s25 = sadd.s32 4294967295, %s814_s21   ;;  %s814_s21 = sphi %s855_s21, %s1021_s21   ;;  %s810_s20 = sphi %s853_s20, %s1020_s20   ;;  %s806_s19 = sphi %s851_s19, %s1019_s19   ;;  %s802_s18 = sphi %s849_s18, %s1018_s18   ;;  %s175_s24 = int_to_ptr.hbm [resolvable:$true] %s174_s24 }
   0x7   : > { %p605_p0 = scmp.ge.s32.totalorder %s814_s21, 1  ;;  %p43_p1 = scmp.eq.s32.totalorder %s873_s25, 0 }
   0x8   : > { %p163_p2 = scmp.lt.s32.totalorder %s814_s21, 3  ;;  %s816_s27 = smov [#allocation5]  }
   0x9   : > { %s176_s28 = sshll.u32 %s816_s27, 4  ;;  %s817_s29 = smov 128   ;;  %s177_s28 = int_to_ptr.vmem [resolvable:$true] %s176_s28 }
   0xa   : > { %p878_p3 = pnand %p605_p0, %p163_p2  ;;  %s818_s30 = smov 8  }
   0xb   : > { %s604_s6 = sadd.s32 4294967294, %s814_s21   ;;  %s889_s7 = sadd.s32 1, %s814_s21  }
   0xc   : > { %p626_p4 = pneg %p878_p3  ;;  %s29_s8 = sadd.s32 1, %s810_s20 }
   0xd   : > { %s26_s9 = ssub.s32 %s814_s21, %s889_s7  ;;  %p36_p7 = scmp.ne.s32.totalorder %s810_s20, %s806_s19 }
   0xe   : > { %p627_p6 = pnand %p626_p4, %p43_p1  ;;  %p27_p8 = scmp.eq.s32.totalorder %s26_s9, 0 }
   0xf   : > { %p37_p9 = scmp.eq.s32.totalorder %s814_s21, 0  ;;  %p42_p10 = scmp.ne.s32.totalorder %s806_s19, %s802_s18 }
  0x10   : > { %629 = dma.hbm_to_vmem [thread:$0]  (!%p627_p6), %s175_s24, 512, %s177_s28, [#allocation6], %s817_s29, %s817_s29, %s818_s30  }
  0x11   : > { %p150_p11 = scmp.eq.s32.totalorder %s873_s25, 1  ;;  %p905_p12 = por %p43_p1, %p42_p10 }
  0x12   : > { %s901_s10 = scalar_select %p27_p8, %s810_s20, %s29_s8  }
  0x13   : > { %p909_p13 = por %p150_p11, %p36_p7  ;;  %p156_p0 = scmp.eq.s32.totalorder %s604_s6, 1 }
  0x14   : > { %p38_p2 = por %p37_p9, %p36_p7  ;;  %s199_s13 = sand.u32 1, %s810_s20  }
  0x15   : > { %p914_p4 = por %p156_p0, %p42_p10  ;;  %p639_p6 = scmp.lt.s32.totalorder %s814_s21, 2 }
  0x16   : > { %s608_s15 = sshll.u32 %s199_s13, 3  ;;  %s609_s16 = sshll.u32 %s814_s21, 3 }
  0x17   : > { %s207_s23 = scalar_lea.hbm %s1006_s0, %s609_s16  ;;  %s203_s27 = scalar_lea.vmem [#allocation2], %s608_s15 }
  0x18   : > { %s209_s24 = sshll.u32 %s207_s23, 4  ;;  %s211_s28 = sshll.u32 %s203_s27, 4  ;;  %s210_s24 = int_to_ptr.hbm [resolvable:$true] %s209_s24  ;;  %s212_s28 = int_to_ptr.vmem [resolvable:$true] %s211_s28 }
  0x19   : > { %p923_p8 = pnand %p639_p6, %p38_p2  ;;  %s200_s30 = scalar_lea.sflag [#allocation3], %s199_s13 }
  0x1a   : > { %s714_s6 = sshra.s32 %s210_s24, 4  ;;  %s721_s15 = scalar_lea.hbm %s1006_s0, 16  ;;  %s715_s6 = int_to_ptr.hbm [resolvable:$true] %s714_s6 }
  0x1b   : > { %s716_s8 = scalar_lea.hbm %s715_s6, 8  ;;  %p718_p9 = pneg %p923_p8 }
  0x1c   : > { %p717_p7 = scmp.ne.s32.totalorder %s715_s6, %s716_s8  ;;  %p722_p0 = scmp.lt.s32.totalorder %s715_s6, %s1006_s0 }
  0x1d   : > { %p723_p2 = scmp.lt.s32.totalorder %s721_s15, %s716_s8 }
  0x1e   : > { %p719_p10 = pnand %p718_p9, %p717_p7 }
  0x1f   : > { %p724_p6 = por %p723_p2, %p722_p0 }
  0x20   : > { %p720_p11 = pneg %p719_p10 }
  0x22   : > { %p725_p5 = pnand %p724_p6, %p720_p11 }
  0x24   : > { %728 = shalt.err (!%p725_p5)
}
  0x25   : > { %633 = dma.hbm_to_vmem [thread:$0]  (!%p923_p8), %s210_s24, 128, %s212_s28, %s200_s30  }
  0x26   : > { %220 = sbr.rel (%p878_p3) target bundleno = 493 (0x1ed), region = 40  ;;  %s940_s13 = sand.u32 (!%p878_p3), 1, %s806_s19  }
  0x27   : > { %s611_s23 = sshll.u32 (!%p878_p3), %s940_s13, 3  ;;  %s223_s27 = scalar_lea.sflag (!%p878_p3), [#allocation3], %s940_s13 }
  0x28   : > { %s226_s6 = scalar_lea.vmem (!%p878_p3), [#allocation2], %s611_s23 }
  0x2b   : > { %789 = dma.done.wait (%p905_p12), %s223_s27, 128  }
  0x2c   : > { %791 = vsyncadd (%p905_p12), %s223_s27, 4294967168 }
  0x2d   : > { %793 = dma.done.wait (%p43_p1), [#allocation6], 512  }
  0x2e   : > { %795 = vsyncadd (%p43_p1), [#allocation6], 4294966784  ;;  %vm268_vm0 = vcmask 261120   ;;  %v263_v0 = vld [vmem:[#allocation5 + $0x18] sm:$0xff]  ;;  %v262_v1 = vld [vmem:[#allocation5 + $0x10] sm:$0xff]  ;;  %s615_s24 = sshll.u32 %s873_s25, 3 }
  0x2f   : > { %v261_v2 = vld [vmem:[#allocation5 + $0x8] sm:$0xff]  ;;  %v284_v3 = vand.u32 4294901760, %v263_v0  ;;  %v286_v4 = vand.u32 4294901760, %v262_v1  ;;  %v260_v6 = vld [vmem:[#allocation5] sm:$0xff]  ;;  %v954_v7 = vld [vmem:[%s226_s6] sm:$0xff]  ;;  %s519_s15 = scalar_lea.hbm %s1011_s5, %s615_s24  ;;  %s258_s25 = scalar_lea.vmem [#allocation7], %s611_s23 }
  0x30   : > { %v288_v5 = vand.u32 4294901760, %v261_v2  ;;  %v290_v8 = vand.u32 4294901760, %v260_v6  ;;  %v270_v9 = vsel %vm268_vm0, %v954_v7, 0  ;;  %v677_v31 = vld [vmem:[%s1008_s2] ss:$0 sm:$0xff]  ;;  %s521_s17 = sshll.u32 %s258_s25, 4  ;;  %s522_s17 = int_to_ptr.vmem [resolvable:$true] %s521_s17 }
  0x31   : > { %v314_v10 = vsub.f32 %v263_v0, %v284_v3  ;;  %285 = vmatpush.msra.mxu0 %v284_v3  ;;  %v320_v11 = vsub.f32 %v262_v1, %v286_v4  ;;  %385 = vmatpush.msra.mxu3 %v284_v3  ;;  %v292_v13 = vand.u32 4294901760, %v270_v9  ;;  %s523_s22 = sshll.u32 %s519_s15, 4  ;;  %s509_s27 = scalar_lea.sflag [#allocation4], %s940_s13  ;;  %s524_s22 = int_to_ptr.hbm [resolvable:$true] %s523_s22 }
  0x32   : > { %v326_v12 = vsub.f32 %v261_v2, %v288_v5  ;;  %v332_v14 = vsub.f32 %v260_v6, %v290_v8  ;;  %s758_s6 = sshra.s32 %s524_s22, 4  ;;  %s764_s23 = scalar_lea.hbm %s1011_s5, 16  ;;  %s759_s6 = int_to_ptr.hbm [resolvable:$true] %s758_s6 }
  0x33   : > { %356 = vmatpush.msra.mxu2 %v314_v10  ;;  %287 = vmatpush.msra.mxu0 %v286_v4  ;;  %v315_v15 = vand.u32 4294901760, %v314_v10  ;;  %v321_v16 = vand.u32 4294901760, %v320_v11  ;;  %v293_v17 = vsub.f32 %v270_v9, %v292_v13  ;;  %v678_v9 = vld [vmem:[%s1009_s3] ss:$0 sm:$0xff]  ;;  %s760_s26 = scalar_lea.hbm %s759_s6, 8  ;;  %p765_p12 = scmp.lt.s32.totalorder %s759_s6, %s1011_s5 }
  0x34   : > { %v327_v18 = vand.u32 4294901760, %v326_v12  ;;  %387 = vmatpush.msra.mxu3 %v286_v4  ;;  %v333_v19 = vand.u32 4294901760, %v332_v14  ;;  %p761_p1 = scmp.ne.s32.totalorder %s759_s6, %s760_s26  ;;  %p766_p8 = scmp.lt.s32.totalorder %s764_s23, %s760_s26 }
  0x35   : > { %359 = vmatpush.msra.mxu2 %v320_v11  ;;  %v316_v20 = vsub.f32 %v314_v10, %v315_v15  ;;  %289 = vmatpush.msra.mxu0 %v288_v5  ;;  %v322_v21 = vsub.f32 %v320_v11, %v321_v16  ;;  %v294_v23 = vand.u32 4294901760, %v293_v17 }
  0x36   : > { %v328_v22 = vsub.f32 %v326_v12, %v327_v18  ;;  %389 = vmatpush.msra.mxu3 %v288_v5  ;;  %v334_v27 = vsub.f32 %v332_v14, %v333_v19  ;;  %p762_p3 = pnand %p761_p1, %p909_p13  ;;  %p767_p7 = por %p766_p8, %p765_p12 }
  0x37   : > { %v317_v24 = vand.u32 4294901760, %v316_v20  ;;  %362 = vmatpush.msra.mxu2 %v326_v12  ;;  %v323_v25 = vand.u32 4294901760, %v322_v21  ;;  %291 = vmatpush.msra.mxu0 %v290_v8  ;;  %v295_v26 = vsub.f32 %v293_v17, %v294_v23  ;;  %v679_v12 = vld [vmem:[%s1010_s4] ss:$0 sm:$0xff] }
  0x38   : > { %391 = vmatpush.msra.mxu3 %v290_v8  ;;  %v329_v28 = vand.u32 4294901760, %v328_v22  ;;  %v335_v30 = vand.u32 4294901760, %v334_v27  ;;  %p763_p5 = pneg %p762_p3 }
  0x39   : > { %414 = vmatpush.msrb.mxu0 %v315_v15  ;;  %318 = vmatpush.msra.mxu1 %v317_v24  ;;  %v296_v29 = vand.u32 4294901760, %v295_v26 }
  0x3a   : > { %365 = vmatpush.msra.mxu2 %v332_v14  ;;  %395 = vmatmul.f32.vlgmr.msra.gmra.mxu3 %v294_v23  ;;  %p768_p9 = pnand %p767_p7, %p763_p5 }
  0x3b   : > { %368 = vmatmul.f32.vlgmr.msra.gmra.mxu2 %v293_v17  ;;  %324 = vmatpush.msra.mxu1 %v323_v25 }
  0x3c   : > { %297 = vmatmul.f32.vlgmr.msra.gmra.mxu0 %v296_v29 }
  0x3d   : > { %418 = vmatpush.msrb.mxu0 %v321_v16  ;;  %330 = vmatpush.msra.mxu1 %v329_v28 }
  0x3f   : > { %422 = vmatpush.msrb.mxu0 %v327_v18  ;;  %336 = vmatpush.msra.mxu1 %v335_v30 }
  0x40   : > { %338 = vmatmul.f32.vlgmr.msra.gmra.mxu1 %v292_v13 }
  0x41   : > { %426 = vmatpush.msrb.mxu0 %v333_v19  ;;  %445 = vmatpush.msrb.mxu1 %v284_v3 }
  0x43   : > { %447 = vmatpush.msrb.mxu1 %v286_v4 }
  0x44   : > { %428 = vmatmul.f32.vlgmr.msrb.gmra.mxu0 %v292_v13 }
  0x45   : > { %449 = vmatpush.msrb.mxu1 %v288_v5 }
  0x47   : > { %451 = vmatpush.msrb.mxu1 %v290_v8 }
  0x48   : > { %453 = vmatmul.f32.vlgmr.msrb.gmra.mxu1 %v292_v13 }
  0xb9   : > { %v298_v32 = vpop.f32.mrf.mxu0 }
  0xba   : > { %v299_v33 = vadd.f32 %v677_v31, %v298_v32 }
  0xbd   : > { %v339_v34 = vpop.f32.mrf.mxu1  ;;  %v396_v37 = vpop.f32.mrf.mxu3 }
  0xbe   : > { %v369_v35 = vpop.f32.mrf.mxu2  ;;  %v340_v36 = vadd.f32 %v339_v34, %v299_v33 }
  0xc0   : > { %v370_v38 = vadd.f32 %v369_v35, %v340_v36 }
  0xc1   : > { %v429_v39 = vpop.f32.mrf.mxu0 }
  0xc2   : > { %v397_v40 = vadd.f32 %v396_v37, %v370_v38 }
  0xc4   : > { %v430_v41 = vadd.f32 %v429_v39, %v397_v40 }
  0xc5   : > { %v454_v42 = vpop.f32.mrf.mxu1 }
  0xc6   : > { %v455_v43 = vadd.f32 %v454_v42, %v430_v41 }
  0xc8   : > { %v457_v44 = vsel %vm268_vm0, %v455_v43, 0.0 }
  0xc9   : > { %458 = vadd.xlane.f32.xlu0 %v457_v44 }
 0x13c   : > { %v459_v45 = vpop.xlane.xlu0 %458 }
 0x13d   : > { %v460_v46 = vmul.f32 0.03125, %v459_v45 }
 0x13f   : > { %v461_v47 = vsub.f32 %v455_v43, %v460_v46 }
 0x141   : > { %v462_v48 = vmul.f32 %v461_v47, %v461_v47 }
 0x143   : > { %v463_v49 = vsel %vm268_vm0, %v462_v48, 0.0 }
 0x144   : > { %464 = vadd.xlane.f32.xlu0 %v463_v49 }
 0x1b7   : > { %v465_v50 = vpop.xlane.xlu0 %464 }
 0x1b8   : > { %v466_v51 = vmul.f32 0.032258064, %v465_v50 }
 0x1ba   : > { %680 = vrsqrt.f32 %v466_v51  ;;  %vm474_vm1 = vcmp.eq.f32.partialorder %v466_v51, inf  ;;  %v477_v59 = vand.u32 2147483648, %v466_v51  ;;  %vm476_vm2 = vcmp.eq.f32.partialorder %v466_v51, 0.0 }
 0x1c0   : > { %v681_v52 = vpop.eup %680 }
 0x1c1   : > { %v468_v53 = vmul.f32 %v681_v52, %v466_v51 }
 0x1c3   : > { %v469_v54 = vmul.f32 %v681_v52, %v468_v53 }
 0x1c5   : > { %v470_v55 = vmul.f32 0.5, %v469_v54 }
 0x1c7   : > { %v471_v56 = vsub.f32 1.5, %v470_v55 }
 0x1c9   : > { %v472_v57 = vmul.f32 %v681_v52, %v471_v56 }
 0x1cb   : > { %v473_v58 = vmul.f32 %v472_v57, %v466_v51 }
 0x1cd   : > { %v475_v60 = vsel %vm474_vm1, %v466_v51, %v473_v58 }
 0x1ce   : > { %v478_v61 = vsel %vm476_vm2, %v477_v59, %v475_v60 }
 0x1cf   : > { %v479_v62 = vadd.f32 1e-06, %v478_v61 }
 0x1d1   : > { %682 = vrcp.f32 %v479_v62  ;;  %v491_v2 = vand.u32 2147483648, %v479_v62  ;;  %v489_v4 = vand.u32 2147483647, %v479_v62  ;;  %vm485_vm4 = vweird.f32 %v479_v62 }
 0x1d3   : > { %v492_v6 = vor.u32 1.1754944e-38, %v491_v2  ;;  %vm490_vm6 = vcmp.eq.f32.partialorder %v489_v4, 8.507059e+37 }
 0x1d7   : > { %v683_v63 = vpop.eup %682 }
 0x1d8   : > { %v481_v0 = vmul.f32 %v683_v63, %v479_v62  ;;  %vm486_vm3 = vweird.f32 %v683_v63 }
 0x1d9   : > { %vm487_vm5 = vmor %vm485_vm4, %vm486_vm3 }
 0x1da   : > { %v482_v1 = vsub.f32 1.0, %v481_v0 }
 0x1dc   : > { %v483_v3 = vmul.f32 %v683_v63, %v482_v1 }
 0x1de   : > { %v484_v5 = vadd.f32 %v683_v63, %v483_v3 }
 0x1e0   : > { %v488_v8 = vsel %vm487_vm5, %v683_v63, %v484_v5 }
 0x1e1   : > { %v493_v10 = vsel %vm490_vm6, %v492_v6, %v488_v8 }
 0x1e2   : > { %v495_v11 = vmul.f32 %v493_v10, %v461_v47 }
 0x1e4   : > { %v500_v13 = vmul.f32 %v678_v9, %v495_v11 }
 0x1e6   : > { %v505_v14 = vadd.f32 %v679_v12, %v500_v13 }
 0x1e8   : > { %v506_v15 = vadd.f32 %v505_v14, %v954_v7 }
 0x1ea   : > { %507 = vst.msk [vmem:[%s258_s25] sm:$0xff] %vm268_vm0, %v506_v15 }
 0x1eb   : > { %771 = shalt.err (!%p768_p9)
}
 0x1ec   : > { %624 = dma.vmem_to_hbm [thread:$0]  (%p909_p13), %s522_s17, 128, %s524_s22, %s509_s27  }
 0x1ed PF: > { %s535_s13 = sand.u32 1, %s802_s18   ;;  %p1017_p10 = scmp.ge.s32.totalorder %s814_s21, 2 }
 0x1ee   : > { %s536_s30 = scalar_lea.sflag [#allocation4], %s535_s13 }
 0x1ef   : > { %p635_p11 = pnand %p1017_p10, %p914_p4 }
 0x1f1   : > { %p636_p0 = pneg %p635_p11 }
 0x1f3   : > { %797 = dma.done.wait (%p636_p0), %s536_s30, 128  }
 0x1f4   : > { %799 = vsyncadd (%p636_p0), %s536_s30, 4294967168  ;;  %p19_p2 = scmp.ge.s32.totalorder %s889_s7, 4   ;;  %s1018_s18 = smov %s806_s19 }
 0x1f5   : > { %s1019_s19 = smov %s810_s20  ;;  %s1020_s20 = smov %s901_s10 }
 0x1f6   : > { %s1021_s21 = smov %s889_s7  ;;  %21 = sbr.rel (!%p19_p2) target bundleno = 6 (0x6), region = 89 }
 0x1fb   :  { %542 = vsyncpa [#allocation3], 1 }
 0x1fc   :  { %544 = vsyncpa [#allocation3 + $0x1], 1 }
 0x1fd   :  { %545 = vsyncpa [#allocation6], 1 }
 0x1fe   :  { %546 = vsyncpa [#allocation4], 1 }
 0x1ff   :  { %548 = vsyncpa [#allocation4 + $0x1], 1 }

</bundles_post_ra>
